<compile_context>
chip_gen: v7x
topology: tpu7x:2x2x1
jax: 0.10.0
libtpu: 0.0.40
codegen_flags: <defaults>
</compile_context>

<pallas_src>
import jax
import jax.numpy as jnp
from jax.experimental import pallas as pl
from jax.experimental.pallas import tpu as pltpu


def _round_up(x, m):
    return (x + m - 1) // m * m


def _pick_tile(dim, cap, align):
    """Return (tile, padded_dim).

    Preference order: full-dim tile (no (8,128) constraint, no padding), then
    a divisor tile >= cap/2 (no padding), else a cap-sized tile with padding.
    """
    if dim <= cap:
        return dim, dim
    t = cap
    lo = max(align, cap // 2)
    while t >= lo:
        if dim % t == 0:
            return t, dim
        t -= align
    return cap, _round_up(dim, cap)


def _linear_kernel_nored(x_ref, w_ref, o_ref):
    """K fits in a single tile: one MXU dot per (i, j), f32 accumulate."""
    o_ref[...] = jnp.dot(
        x_ref[...], w_ref[...], preferred_element_type=jnp.float32
    ).astype(o_ref.dtype)


def _linear_kernel_red(x_ref, w_ref, o_ref, acc_ref):
    """Large K: f32 VMEM accumulator resident across the k (reduction) axis."""
    @pl.when(pl.program_id(2) == 0)
    def _():
        acc_ref[...] = jnp.zeros_like(acc_ref)

    acc_ref[...] += jnp.dot(
        x_ref[...], w_ref[...], preferred_element_type=jnp.float32
    )

    @pl.when(pl.program_id(2) == pl.num_programs(2) - 1)
    def _():
        o_ref[...] = acc_ref[...].astype(o_ref.dtype)


def prepare_decoder_weight(weight_out_in):
    """One-time transpose (amortize at parameter load) of the PyTorch
    (out_features, in_features) weight into the MXU-friendly (in, out) layout
    so kernel tiles are canonical (K, N) with N on lanes."""
    return jnp.asarray(weight_out_in).T


def decoder_network_forward(x, weight_kn):
    """y = x @ weight_kn   (== torch.nn.Linear(bias=False) forward).

    x:         [..., in_features]
    weight_kn: [in_features, out_features]  (from prepare_decoder_weight)
    """
    K = x.shape[-1]
    Kw, N = weight_kn.shape
    assert Kw == K, "weight must be pre-transposed to (in_features, out_features)"
    lead_shape = x.shape[:-1]

    x2d = x.reshape(-1, K)  # [M, K]
    M = x2d.shape[0]

    itemsize = jnp.dtype(x.dtype).itemsize
    if itemsize <= 2:  # bf16 / fp8
        tm_cap, tn_cap, tk_cap = 512, 1024, 2048   # ~16 MiB double-buffered
    else:              # f32
        tm_cap, tn_cap, tk_cap = 512, 1024, 1024   # ~18 MiB double-buffered

    # Stream the dominant operand from HBM exactly once when shapes are very
    # skewed: decode / LM-head (N >> M) -> cover all of M in one tile so the
    # weight is read once; long prefill (M >> N) -> cover all of N instead.
    if N >= 4 * M and M <= 2 * tm_cap:
        tm_cap = max(tm_cap, _round_up(M, 8))
    elif M >= 4 * N and N <= 2 * tn_cap:
        tn_cap = max(tn_cap, _round_up(N, 256))

    tm, Mp = _pick_tile(M, tm_cap, 8)     # sublane-aligned
    tn, Np = _pick_tile(N, tn_cap, 256)   # 256-aligned for 2x256x256 MXUs
    tk, Kp = _pick_tile(K, tk_cap, 128)   # lane-aligned

    # v7x has 2 TensorCores sharded across the parallel grid axes: if the
    # parallel grid collapsed to 1x1 but there is enough work, split one axis.
    if Mp // tm == 1 and Np // tn == 1:
        if N >= 512 and N % 256 == 0:
            tn = N // 2
        elif M >= 512 and M % 16 == 0:
            tm = M // 2

    grid_m, grid_n, grid_k = Mp // tm, Np // tn, Kp // tk

    # Pad only when a ragged edge actually fires (rare with the tile choices
    # above).  TODO(synk): mask the ragged N/K edge in-kernel instead of
    # materializing a padded copy of a huge, non-aligned weight.
    xp = x2d if (Mp == M and Kp == K) else jnp.pad(
        x2d, ((0, Mp - M), (0, Kp - K)))
    wp = weight_kn if (Kp == K and Np == N) else jnp.pad(
        weight_kn, ((0, Kp - K), (0, Np - N)))

    # Advisory cost estimate; bytes account for operand re-streaming.
    cost = pl.CostEstimate(
        flops=2 * M * N * K,
        transcendentals=0,
        bytes_accessed=(itemsize * (grid_n * Mp * Kp + grid_m * Kp * Np)
                        + itemsize * Mp * Np),
    )

    use_red = grid_k > 1
    vmem_bytes = 2 * (tm * tk + tk * tn + tm * tn) * itemsize
    if use_red:
        vmem_bytes += tm * tn * 4  # f32 accumulator
    vmem_limit = min(64 * 1024 * 1024,
                     max(32 * 1024 * 1024, vmem_bytes + 8 * 1024 * 1024))

    if use_red:
        kernel = _linear_kernel_red
        grid = (grid_m, grid_n, grid_k)
        in_specs = [
            pl.BlockSpec((tm, tk), lambda i, j, k: (i, k)),
            pl.BlockSpec((tk, tn), lambda i, j, k: (k, j)),
        ]
        out_specs = pl.BlockSpec((tm, tn), lambda i, j, k: (i, j))
        scratch_shapes = [pltpu.VMEM((tm, tn), jnp.float32)]
        dim_sem = ("parallel", "parallel", "arbitrary")
    else:
        kernel = _linear_kernel_nored
        grid = (grid_m, grid_n)
        in_specs = [
            pl.BlockSpec((tm, tk), lambda i, j: (i, 0)),
            pl.BlockSpec((tk, tn), lambda i, j: (0, j)),
        ]
        out_specs = pl.BlockSpec((tm, tn), lambda i, j: (i, j))
        scratch_shapes = []
        dim_sem = ("parallel", "parallel")

    out = pl.pallas_call(
        kernel,
        out_shape=jax.ShapeDtypeStruct((Mp, Np), x.dtype),
        grid_spec=pltpu.PrefetchScalarGridSpec(
            num_scalar_prefetch=0,
            grid=grid,
            in_specs=in_specs,
            out_specs=out_specs,
            scratch_shapes=scratch_shapes,
        ),
        compiler_params=pltpu.CompilerParams(
            dimension_semantics=dim_sem,
            vmem_limit_bytes=vmem_limit,
        ),
        cost_estimate=cost,
    )(xp, wp)

    out = out[:M, :N]  # strip alignment padding (no-op when none was added)
    return out.reshape(*lead_shape, N)


if __name__ == "__main__":
    key = jax.random.PRNGKey(0)
    k_x, k_w = jax.random.split(key)

    batch, seq = 2, 8
    in_features, out_features = 32, 64

    x = jax.random.normal(k_x, (batch, seq, in_features), dtype=jnp.float32)
    # Deterministic synthetic weight in nn.Linear's (out, in) layout.
    bound = 1.0 / (in_features ** 0.5)
    weight = jax.random.uniform(
        k_w, (out_features, in_features), dtype=jnp.float32,
        minval=-bound, maxval=bound,
    )

    # One-time weight prep (amortized over all forward calls in real use).
    w_kn = prepare_decoder_weight(weight)

    y = decoder_network_forward(x, w_kn)
    y = jax.block_until_ready(y)

    # Reference check against plain JAX (same semantics as torch Linear).
    y_ref = jnp.einsum("bsk,nk->bsn", x, weight)
    assert y.shape == (batch, seq, out_features)
    assert jnp.allclose(y, y_ref, atol=1e-5, rtol=1e-5)

    print("KERNEL_OK")
</pallas_src>

<mosaic_0001>
module attributes {stable_mosaic.version = 11 : i64} {
  func.func @_linear_kernel_nored(%arg0: i32, %arg1: i32, %arg2: memref<16x32xf32, #tpu.memory_space<vmem>>, %arg3: memref<32x64xf32, #tpu.memory_space<vmem>>, %arg4: memref<16x64xf32, #tpu.memory_space<vmem>>) attributes {dimension_semantics = [#tpu.dimension_semantics<parallel>, #tpu.dimension_semantics<parallel>], iteration_bounds = array<i64: 1, 1>, scalar_prefetch = 0 : i64, scratch_operands = 0 : i64, tpu.core_type = #tpu.core_type<tc>, window_params = [{transform_indices = @transform_0, window_bounds = array<i64: 16, 32>}, {transform_indices = @transform_1, window_bounds = array<i64: 32, 64>}, {transform_indices = @transform_2, window_bounds = array<i64: 16, 64>}]} {
    %c0 = arith.constant 0 : index
    %c0_0 = arith.constant 0 : index
    %0 = vector.load %arg2[%c0, %c0_0] : memref<16x32xf32, #tpu.memory_space<vmem>>, vector<16x32xf32>
    %c0_1 = arith.constant 0 : index
    %c0_2 = arith.constant 0 : index
    %1 = vector.load %arg3[%c0_1, %c0_2] : memref<32x64xf32, #tpu.memory_space<vmem>>, vector<32x64xf32>
    %cst = arith.constant dense<0.000000e+00> : vector<16x64xf32>
    %2 = tpu.matmul %0, %1, %cst {dimension_numbers = #tpu.dot_dimension_numbers<[1], [0], [0], [1], [0, 0, 1, 1], [], []>} : vector<16x32xf32>, vector<32x64xf32>, vector<16x64xf32> -> vector<16x64xf32>
    %c0_3 = arith.constant 0 : index
    %c0_4 = arith.constant 0 : index
    %3 = vector.load %arg4[%c0_3, %c0_4] : memref<16x64xf32, #tpu.memory_space<vmem>>, vector<16x64xf32>
    tpu.vector_store %arg4[%c0_3, %c0_4], %2 {strides = array<i32>} : memref<16x64xf32, #tpu.memory_space<vmem>>, vector<16x64xf32>,
    return
  }
  func.func @transform_0(%arg0: i32, %arg1: i32) -> (i32, i32) {
    %c0_i32 = arith.constant 0 : i32
    %c0_i32_0 = arith.constant 0 : i32
    return %arg0, %c0_i32 : i32, i32
  }
  func.func @transform_1(%arg0: i32, %arg1: i32) -> (i32, i32) {
    %c0_i32 = arith.constant 0 : i32
    %c0_i32_0 = arith.constant 0 : i32
    return %c0_i32, %arg1 : i32, i32
  }
  func.func @transform_2(%arg0: i32, %arg1: i32) -> (i32, i32) {
    %c0_i32 = arith.constant 0 : i32
    return %arg0, %arg1 : i32, i32
  }
}

</mosaic_0001>

<bundles_post_ra>
// kernel: tpu_custom_call.1
= control target key start
LH: loop header
LB: loop body
LE: loop exit
PB: predicated region body
PF: predicated region fallthrough
CT: control target
= control target key end

     0   :  { %7 = vsyncpa [#allocation3], 0  ;;  %s318_s0 = inlined_call_operand.hbm [shape: f32[16,32], index: 0, kind: input, shape index: {}]   ;;  %s319_s1 = inlined_call_operand.hbm [shape: f32[32,64], index: 1, kind: input, shape index: {}]   ;;  %s320_s2 = inlined_call_operand.hbm [shape: f32[16,64], index: 2, kind: output, shape index: {}]  }
   0x1   :  { %8 = vsyncpa [#allocation6], 0 }
   0x2   :  { %9 = vsyncpa [#allocation4], 0  ;;  %s253_s9 = smov [#allocation2]   ;;  %s181_s13 = scalar_lea.hbm %s318_s0, 256 }
   0x3   :  { %s15_s10 = sshll.u32 %s253_s9, 4  ;;  %p182_p0 = scmp.ne.s32.totalorder %s318_s0, %s181_s13  ;;  %s16_s10 = int_to_ptr.vmem [resolvable:$true] %s15_s10 }
   0x4   :  { %p185_p1 = scmp.lt.u32.totalorder %s181_s13, %s318_s0 }
   0x6   :  { %p187_p2 = pnand %p185_p1, %p182_p0 }
   0x8   :  { %190 = shalt.err (!%p187_p2)
}
   0x9   :  { %s191_s18 = scalar_lea.vmem %s16_s10, 256  ;;  %p196_p4 = scmp.lt.s32.totalorder %s16_s10, %s16_s10 }
   0xa   :  { %p192_p3 = scmp.ne.s32.totalorder %s16_s10, %s191_s18  ;;  %p197_p5 = scmp.lt.s32.totalorder %s191_s18, %s191_s18 }
   0xc   :  { %p198_p6 = por %p197_p5, %p196_p4 }
   0xe   :  { %p199_p7 = pnand %p198_p6, %p192_p3 }
  0x10   :  { %202 = shalt.err (!%p199_p7)
}
  0x11   :  { %s254_s19 = smov 128   ;;  %s255_s20 = smov 8  }
  0x12   :  { %21 = dma.hbm_to_vmem [thread:$0]  %s318_s0, 256, %s16_s10, [#allocation3], %s254_s19, %s254_s19, %s255_s20  }
  0x13   :  { %s256_s23 = smov [#allocation5]   ;;  %s203_s27 = scalar_lea.hbm %s319_s1, 512 }
  0x14   :  { %s27_s24 = sshll.u32 %s256_s23, 4  ;;  %p204_p8 = scmp.ne.s32.totalorder %s319_s1, %s203_s27  ;;  %s28_s24 = int_to_ptr.vmem [resolvable:$true] %s27_s24 }
  0x15   :  { %p207_p9 = scmp.lt.u32.totalorder %s203_s27, %s319_s1 }
  0x17   :  { %p209_p10 = pnand %p207_p9, %p204_p8 }
  0x19   :  { %212 = shalt.err (!%p209_p10)
}
  0x1a   :  { %s213_s4 = scalar_lea.vmem %s28_s24, 512  ;;  %p218_p12 = scmp.lt.s32.totalorder %s28_s24, %s28_s24 }
  0x1b   :  { %p214_p11 = scmp.ne.s32.totalorder %s28_s24, %s213_s4  ;;  %p219_p13 = scmp.lt.s32.totalorder %s213_s4, %s213_s4 }
  0x1d   :  { %p220_p0 = por %p219_p13, %p218_p12 }
  0x1f   :  { %p221_p1 = pnand %p220_p0, %p214_p11 }
  0x21   :  { %224 = shalt.err (!%p221_p1)
}
  0x22   :  { %33 = dma.hbm_to_vmem [thread:$0]  %s319_s1, 512, %s28_s24, [#allocation6], %s254_s19, %s254_s19, %s255_s20  }
  0x23   :  { %247 = dma.done.wait [#allocation3], 256  }
  0x24   :  { %248 = vsyncadd [#allocation3], 4294967040 }
  0x25   :  { %249 = dma.done.wait [#allocation6], 512  }
  0x26   :  { %250 = vsyncadd [#allocation6], 4294966784  ;;  %vm46_vm0 = vcmask 261120   ;;  %v42_v0 = vld [vmem:[#allocation5] sm:$0xff]  ;;  %v43_v1 = vld [vmem:[#allocation5 + $0x8] sm:$0xff]  ;;  %s257_s1 = smov [#allocation7]  }
  0x27   :  { %v44_v2 = vld [vmem:[#allocation5 + $0x10] sm:$0xff]  ;;  %v168_v3 = vpack.c.bf16 %v43_v1, %v42_v0  ;;  %v45_v4 = vld [vmem:[#allocation5 + $0x18] sm:$0xff]  ;;  %s136_s6 = sshll.u32 %s257_s1, 4  ;;  %vm128_vm1 = vcmask 523264   ;;  %s137_s6 = int_to_ptr.vmem [resolvable:$true] %s136_s6 }
  0x28   :  { %v40_v5 = vld [vmem:[#allocation2] sm:$0xff]  ;;  %v172_v6 = vpack.c.bf16 %v45_v4, %v44_v2  ;;  %v41_v7 = vld [vmem:[#allocation2 + $0x8] sm:$0xff]  ;;  %s225_s7 = scalar_lea.vmem %s137_s6, 256  ;;  %p230_p3 = scmp.lt.s32.totalorder %s137_s6, %s137_s6 }
  0x29   :  { %165 = vmatprep.mubr.msk.f32.mxu0 %vm46_vm0, %v40_v5  ;;  %169 = vmatprep.subr.bf16.mxu0 %v168_v3  ;;  %p226_p2 = scmp.ne.s32.totalorder %s137_s6, %s225_s7  ;;  %p231_p4 = scmp.lt.s32.totalorder %s225_s7, %s225_s7 }
  0x2a   :  { %171 = vmatpush3.bf16.msra.mxu0 %v168_v3 }
  0x2b   :  { %173 = vmatprep.subr.bf16.mxu0 %v172_v6  ;;  %p232_p5 = por %p231_p4, %p230_p3 }
  0x2d   :  { %p233_p6 = pnand %p232_p5, %p226_p2 }
  0x2e   :  { %175 = vmatpush3.bf16.msra.mxu0 %v172_v6 }
  0x31   :  { %166 = vmatmul.mubr.msk.f32.vlgmr.msra.gmra.mrb[0].mxu0 %vm46_vm0, %v41_v7 }
 0x104   :  { %v167_v8 = vpop.f32.mrb[0].mxu0 }
 0x105   :  { %130 = vst.msk [vmem:[#allocation7 + $0x8] sm:$0xff] %vm128_vm1, %v167_v8  ;;  %v119_v9 = vpop.f32.mrb[1].mxu0 }
 0x106   :  { %129 = vst.msk [vmem:[#allocation7] sm:$0xff] %vm128_vm1, %v119_v9 }
 0x107   :  { %236 = shalt.err (!%p233_p6)
}
 0x108   :  { %s237_s10 = scalar_lea.hbm %s320_s2, 256 }
 0x109   :  { %p238_p7 = scmp.ne.s32.totalorder %s320_s2, %s237_s10  ;;  %p241_p8 = scmp.lt.u32.totalorder %s237_s10, %s320_s2 }
 0x10b   :  { %p243_p9 = pnand %p241_p8, %p238_p7 }
 0x10d   :  { %246 = shalt.err (!%p243_p9)
}
 0x10e   :  { %142 = dma.vmem_to_hbm [thread:$0]  %s137_s6, 256, %s320_s2, [#allocation4], %s254_s19, %s254_s19, %s255_s20  }
 0x10f   :  { %251 = dma.done.wait [#allocation4], 256  }
 0x110   :  { %252 = vsyncadd [#allocation4], 4294967040 }
 0x111   :  { %146 = vsyncpa [#allocation3], 1 }
 0x112   :  { %147 = vsyncpa [#allocation6], 1 }
 0x113   :  { %148 = vsyncpa [#allocation4], 1 }

</bundles_post_ra>
